<compile_context>
chip_gen: v7x
topology: tpu7x:2x2x1
jax: 0.10.0
libtpu: 0.0.40
codegen_flags: <defaults>
</compile_context>

<pallas_src>
from functools import partial

import jax
import jax.numpy as jnp
import numpy as np
from jax import lax
from jax.experimental import pallas as pl
from jax.experimental.pallas import tpu as pltpu


# ----------------------------------------------------------------------- hw query
def _vmem_capacity_bytes():
    try:
        return int(getattr(pltpu.get_tpu_info(), "vmem_capacity_bytes"))
    except Exception:
        return 64 << 20                      # conservative default (v7x per-TC VMEM)


_VMEM_CAP = _vmem_capacity_bytes()
# Generation-aware scoped-VMEM ceiling: ~100 MiB on 128-MiB parts (v5e/v6e),
# ~44 MiB on 64-MiB parts (v7x).
_VMEM_CEIL = (100 << 20) if _VMEM_CAP >= (96 << 20) else min(44 << 20, int(_VMEM_CAP * 0.7))


# ------------------------------------------------------------------------- kernel
def _make_kernel(l_tile, l_true, mask_tail):
    def kernel(x_ref, edge_ref, w1_ref, w2_ref, bn_ref, o_ref):
        t = pl.program_id(1)                       # L-tile index
        x = x_ref[0]                               # (Cin, Lt) -- also the residual
        mxu_dt = w1_ref.dtype                      # bf16 (or f32) MXU operand dtype

        bn = bn_ref[...]                           # (C, 4) f32 packed affines
        s1, t1, s2, t2 = bn[:, 0:1], bn[:, 1:2], bn[:, 2:3], bn[:, 3:4]

        # conv1 (k=1): one MXU matmul (f32 accumulate) + folded BN1 affine + ReLU (f32).
        h = jnp.dot(w1_ref[...], x.astype(mxu_dt), preferred_element_type=jnp.float32)
        h = jnp.maximum(h * s1 + t1, 0.0)          # (Cout, Lt) f32
        hb = h.astype(mxu_dt)                      # cast once for the three conv2 taps

        # conv2 (k=3, stride=1, padding=1) as roll-after-matmul.
        a0 = jnp.dot(w2_ref[0], hb, preferred_element_type=jnp.float32)   # tap on h[l-1]
        a1 = jnp.dot(w2_ref[1], hb, preferred_element_type=jnp.float32)   # tap on h[l]
        a2 = jnp.dot(w2_ref[2], hb, preferred_element_type=jnp.float32)   # tap on h[l+1]

        lt = a1.shape[1]
        lane = lax.broadcasted_iota(jnp.int32, a1.shape, 1)
        if mask_tail:
            # Padded tail: h at global positions >= L comes from zero-padded input
            # (relu(t1) != 0); keep it from leaking into y[L-1] via the l+1 tap.
            a2 = jnp.where(lane + t * l_tile >= l_true, 0.0, a2)

        # Lane shifts on the XLU (non-negative shifts); only the wrapped boundary column
        # is patched with the precomputed cross-tile contribution (zero at seq edges).
        edge = edge_ref[0, 0]                      # (Cout, 2) f32 raw conv2 taps
        a0s = jnp.where(lane == 0, edge[:, 0:1], pltpu.roll(a0, shift=1, axis=1))
        a2s = jnp.where(lane == lt - 1, edge[:, 1:2], pltpu.roll(a2, shift=lt - 1, axis=1))

        # Folded BN2 affine, identity residual (identity_downsample=None), ReLU -- f32.
        y = (a1 + a0s + a2s) * s2 + t2
        o_ref[0] = jnp.maximum(y + x.astype(jnp.float32), 0.0).astype(o_ref.dtype)

    return kernel


# ------------------------------------------------------------------------ helpers
def _fold_bn(gamma, beta, mean, var, conv_bias, eps):
    scale = (gamma / jnp.sqrt(var + eps)).astype(jnp.float32)
    shift = (beta + (conv_bias - mean) * scale).astype(jnp.float32)
    return scale, shift                                        # (C,), (C,)


def _choose_l_tile(l_pad, c, in_isize, out_isize, budget, n):
    """Largest power-of-two multiple of 128 dividing l_pad whose per-tile footprint
    (double-buffered in/out tiles + ~6 f32 in-kernel intermediates) fits `budget`."""
    def tile_bytes(lt):
        return 2 * c * lt * (in_isize + out_isize) + 6 * c * lt * 4
    lt = 128
    while (l_pad % (2 * lt) == 0) and tile_bytes(2 * lt) <= budget:
        lt *= 2
    # Keep at least 2 grid steps so both v7x TensorCores get work.
    if n * (l_pad // lt) < 2 and lt >= 256:
        lt //= 2
    return lt


def _build_edges(x, w1, s1, t1, w2_k0, w2_k2, l_tile, nt):
    """(N, nt, Cout, 2) raw conv2 boundary-tap contributions for each L tile:
    [..., 0] = W2[:,:,0] @ relu(bn1(conv1(x[:, :, t*Lt - 1])))   (zero for the first tile)
    [..., 1] = W2[:,:,2] @ relu(bn1(conv1(x[:, :, (t+1)*Lt])))   (zero for the last tile)."""
    n, c, l = x.shape
    starts = jnp.arange(nt) * l_tile
    idx_l = jnp.clip(starts - 1, 0, l - 1)
    idx_r = jnp.clip(starts + l_tile, 0, l - 1)
    xl = jnp.take(x, idx_l, axis=2).astype(jnp.float32)          # (N, Cin, nt)
    xr = jnp.take(x, idx_r, axis=2).astype(jnp.float32)
    s1b, t1b = s1[None, :, None], t1[None, :, None]
    hp = lax.Precision.HIGHEST
    hl = jnp.maximum(jnp.einsum('oc,nct->not', w1, xl, precision=hp) * s1b + t1b, 0.0)
    hr = jnp.maximum(jnp.einsum('oc,nct->not', w1, xr, precision=hp) * s1b + t1b, 0.0)
    el = jnp.einsum('oc,nct->not', w2_k0, hl, precision=hp)
    er = jnp.einsum('oc,nct->not', w2_k2, hr, precision=hp)
    tvec = jnp.arange(nt)
    el = el * (tvec > 0).astype(jnp.float32)[None, None, :]      # conv2 zero-pad at start
    er = er * (tvec < nt - 1).astype(jnp.float32)[None, None, :]  # conv2 zero-pad at end
    edges = jnp.stack([el, er], axis=-1)                          # (N, Cout, nt, 2)
    return jnp.transpose(edges, (0, 2, 1, 3))                     # (N, nt, Cout, 2)


# ------------------------------------------------------------------------ wrapper
@partial(jax.jit, static_argnames=("eps", "l_tile", "use_bf16", "out_bf16"))
def resnet1d_block(x, conv1_w, conv1_b, bn1, conv2_w, conv2_b, bn2,
                   *, eps=1e-5, l_tile=None, use_bf16=True, out_bf16=False):
    """x: (N, C, L) (PyTorch Conv1d layout; f32 or bf16). conv1_w: (C, C, 1),
    conv2_w: (C, C, 3), bn1/bn2: (gamma, beta, running_mean, running_var).
    Inference-mode BatchNorm. Returns (N, C, L)."""
    n, c_in, l = x.shape
    c_out = conv1_w.shape[0]
    if c_in != c_out:
        raise ValueError("identity residual requires in_channels == out_channels")
    c = c_out

    out_dtype = jnp.bfloat16 if out_bf16 else x.dtype
    in_isize = jnp.dtype(x.dtype).itemsize
    out_isize = jnp.dtype(out_dtype).itemsize

    # Pad L up to a multiple of 128 so stores stay lane-dense (no masked vst.msk).
    l_pad = ((l + 127) // 128) * 128
    mask_tail = l_pad != l
    x_p = jnp.pad(x, ((0, 0), (0, 0), (0, l_pad - l))) if mask_tail else x

    # Generation-aware tile choice: biggest lane-dense L tile under the VMEM budget.
    wdt = jnp.bfloat16 if use_bf16 else jnp.float32
    w_bytes = 4 * c * c * jnp.dtype(wdt).itemsize                 # w1 (C,C) + w2 (3,C,C)
    fixed = 2 * (w_bytes + c * 4 * 4 + c * 2 * 4) + (2 << 20)     # weights/bn/edges + margin
    if l_tile is None:
        l_tile = _choose_l_tile(l_pad, c, in_isize, out_isize, _VMEM_CEIL - fixed, n)
    if (l_pad % l_tile != 0) or (l_tile % 128 != 0):
        raise ValueError("l_tile must be a multiple of 128 that divides the padded length")
    nt = l_pad // l_tile

    # Weights and folded BN affines (conv bias folded into the shift).
    w1_f32 = conv1_w[:, :, 0].astype(jnp.float32)                 # (Cout, Cin)
    s1, t1 = _fold_bn(*bn1, conv_bias=conv1_b, eps=eps)
    s2, t2 = _fold_bn(*bn2, conv_bias=conv2_b, eps=eps)
    bn_pack = jnp.stack([s1, t1, s2, t2], axis=1)                 # (C, 4) f32
    w1_k = w1_f32.astype(wdt)                                     # (Cout, Cin)
    w2_k = jnp.transpose(conv2_w, (2, 0, 1)).astype(wdt)          # (3, Cout, Cin)

    # Cross-tile boundary contributions (tiny; one batched XLA matmul, hoisted
    # out of the per-grid-step path).
    edges = _build_edges(x, w1_f32, s1, t1,
                         conv2_w[:, :, 0].astype(jnp.float32),
                         conv2_w[:, :, 2].astype(jnp.float32),
                         l_tile, nt)

    # VMEM limit: double-buffered in/out tiles + weights + ~6 f32 in-kernel temporaries.
    est = 2 * c * l_tile * (in_isize + out_isize) + 6 * c * l_tile * 4 + fixed
    vmem_limit = int(min(_VMEM_CEIL, max(32 << 20, est + (4 << 20))))

    out = pl.pallas_call(
        _make_kernel(l_tile, l, mask_tail),
        out_shape=jax.ShapeDtypeStruct((n, c, l_pad), out_dtype),
        grid_spec=pltpu.PrefetchScalarGridSpec(
            num_scalar_prefetch=0,
            grid=(n, nt),
            in_specs=[
                pl.BlockSpec((1, c, l_tile), lambda b, t: (b, 0, t)),   # x tile
                pl.BlockSpec((1, 1, c, 2), lambda b, t: (b, t, 0, 0)),  # boundary taps
                pl.BlockSpec((c, c), lambda b, t: (0, 0)),              # conv1 weight
                pl.BlockSpec((3, c, c), lambda b, t: (0, 0, 0)),        # conv2 weight
                pl.BlockSpec((c, 4), lambda b, t: (0, 0)),              # packed BN affines
            ],
            out_specs=pl.BlockSpec((1, c, l_tile), lambda b, t: (b, 0, t)),
        ),
        compiler_params=pltpu.CompilerParams(
            dimension_semantics=("parallel", "parallel"),               # megacore-friendly
            vmem_limit_bytes=vmem_limit,
        ),
    )(x_p, edges, w1_k, w2_k, bn_pack)

    return out[:, :, :l] if mask_tail else out


# ---------------------------------------------------------------------- reference
def ref_forward(x_ncl, W1_oik, b1, W2_oik, b2, bn1, bn2, eps=1e-5):
    """Pure-JAX reference of the PyTorch block forward (eval-mode BN)."""
    g1, be1, m1, v1 = bn1
    g2, be2, m2, v2 = bn2
    dn = ("NCH", "OIH", "NCH")
    h = lax.conv_general_dilated(x_ncl, W1_oik, (1,), [(0, 0)], dimension_numbers=dn)
    h = h + b1[None, :, None]
    h = (h - m1[None, :, None]) / jnp.sqrt(v1[None, :, None] + eps) * g1[None, :, None] + be1[None, :, None]
    h = jnp.maximum(h, 0.0)
    y = lax.conv_general_dilated(h, W2_oik, (1,), [(1, 1)], dimension_numbers=dn)
    y = y + b2[None, :, None]
    y = (y - m2[None, :, None]) / jnp.sqrt(v2[None, :, None] + eps) * g2[None, :, None] + be2[None, :, None]
    return jnp.maximum(y + x_ncl, 0.0)


# --------------------------------------------------------------------- demo / test
if __name__ == "__main__":
    key = jax.random.PRNGKey(0)
    N, C, L = 2, 32, 256      # lane-dense L (multiple of 128), small channels
    ks = jax.random.split(key, 12)

    x = jax.random.normal(ks[0], (N, C, L), jnp.float32)
    W1 = jax.random.normal(ks[1], (C, C, 1), jnp.float32) * 0.1   # Conv1d(C, C, k=1)
    b1 = jax.random.normal(ks[2], (C,), jnp.float32) * 0.1
    W2 = jax.random.normal(ks[3], (C, C, 3), jnp.float32) * 0.1   # Conv1d(C, C, k=3, pad=1)
    b2 = jax.random.normal(ks[4], (C,), jnp.float32) * 0.1

    bn1 = (jax.random.normal(ks[5], (C,), jnp.float32) * 0.1 + 1.0,
           jax.random.normal(ks[6], (C,), jnp.float32) * 0.1,
           jax.random.normal(ks[7], (C,), jnp.float32) * 0.1,
           jnp.abs(jax.random.normal(ks[8], (C,), jnp.float32)) * 0.5 + 0.5)
    bn2 = (jnp.ones((C,), jnp.float32) * 0.9,
           jnp.ones((C,), jnp.float32) * 0.05,
           jnp.zeros((C,), jnp.float32),
           jax.random.uniform(ks[9], (C,), jnp.float32, minval=0.5, maxval=1.5))

    ref = ref_forward(x, W1, b1, W2, b2, bn1, bn2)

    # 1) f32 MXU path, forced 128-wide L tiles (2 tiles -> exercises cross-tile edge taps).
    out_f32 = jax.block_until_ready(
        resnet1d_block(x, W1, b1, bn1, W2, b2, bn2, l_tile=128, use_bf16=False))
    np.testing.assert_allclose(np.asarray(out_f32), np.asarray(ref), rtol=1e-4, atol=1e-4)

    # 2) bf16 MXU operands (f32 accumulation), automatic generation-aware L-tile choice.
    out_bf16 = jax.block_until_ready(
        resnet1d_block(x, W1, b1, bn1, W2, b2, bn2, use_bf16=True))
    np.testing.assert_allclose(np.asarray(out_bf16), np.asarray(ref), rtol=3e-2, atol=3e-2)

    # 3) bf16 output storage (halved HBM write traffic), f32 elementwise math in-kernel.
    out_b16o = jax.block_until_ready(
        resnet1d_block(x, W1, b1, bn1, W2, b2, bn2, use_bf16=True, out_bf16=True))
    np.testing.assert_allclose(np.asarray(out_b16o.astype(jnp.float32)), np.asarray(ref),
                               rtol=5e-2, atol=5e-2)

    # 4) L not a multiple of 128 -> padded lane-dense tiles + in-kernel tail mask.
    x2 = jax.random.normal(ks[10], (N, C, 40), jnp.float32)
    ref2 = ref_forward(x2, W1, b1, W2, b2, bn1, bn2)
    out2 = jax.block_until_ready(
        resnet1d_block(x2, W1, b1, bn1, W2, b2, bn2, use_bf16=False))
    np.testing.assert_allclose(np.asarray(out2), np.asarray(ref2), rtol=1e-4, atol=1e-4)

    print("KERNEL_OK")
</pallas_src>

<mosaic_0001>
module attributes {stable_mosaic.version = 11 : i64} {
  func.func @kernel(%arg0: i32, %arg1: i32, %arg2: memref<1x32x128xf32, #tpu.memory_space<vmem>>, %arg3: memref<1x1x32x2xf32, #tpu.memory_space<vmem>>, %arg4: memref<32x32xf32, #tpu.memory_space<vmem>>, %arg5: memref<3x32x32xf32, #tpu.memory_space<vmem>>, %arg6: memref<32x4xf32, #tpu.memory_space<vmem>>, %arg7: memref<1x32x128xf32, #tpu.memory_space<vmem>>) attributes {dimension_semantics = [#tpu.dimension_semantics<parallel>, #tpu.dimension_semantics<parallel>], iteration_bounds = array<i64: 2, 2>, scalar_prefetch = 0 : i64, scratch_operands = 0 : i64, tpu.core_type = #tpu.core_type<tc>, window_params = [{transform_indices = @transform_0, window_bounds = array<i64: 1, 32, 128>}, {transform_indices = @transform_1, window_bounds = array<i64: 1, 1, 32, 2>}, {pipeline_mode = #tpu.pipeline_mode<synchronous>, transform_indices = @transform_2, window_bounds = array<i64: 32, 32>}, {pipeline_mode = #tpu.pipeline_mode<synchronous>, transform_indices = @transform_3, window_bounds = array<i64: 3, 32, 32>}, {pipeline_mode = #tpu.pipeline_mode<synchronous>, transform_indices = @transform_4, window_bounds = array<i64: 32, 4>}, {transform_indices = @transform_5, window_bounds = array<i64: 1, 32, 128>}]} {
    %c0 = arith.constant 0 : index
    %c0_0 = arith.constant 0 : index
    %c0_1 = arith.constant 0 : index
    %0 = vector.load %arg2[%c0, %c0_0, %c0_1] : memref<1x32x128xf32, #tpu.memory_space<vmem>>, vector<1x32x128xf32>
    %1 = vector.shape_cast %0 : vector<1x32x128xf32> to vector<32x128xf32>
    %c0_2 = arith.constant 0 : index
    %c0_3 = arith.constant 0 : index
    %2 = vector.load %arg6[%c0_2, %c0_3] : memref<32x4xf32, #tpu.memory_space<vmem>>, vector<32x4xf32>
    %3 = vector.extract_strided_slice %2 {offsets = [0, 0], sizes = [32, 1], strides = [1, 1]} : vector<32x4xf32> to vector<32x1xf32>
    %4 = vector.extract_strided_slice %2 {offsets = [0, 1], sizes = [32, 1], strides = [1, 1]} : vector<32x4xf32> to vector<32x1xf32>
    %5 = vector.extract_strided_slice %2 {offsets = [0, 2], sizes = [32, 1], strides = [1, 1]} : vector<32x4xf32> to vector<32x1xf32>
    %6 = vector.extract_strided_slice %2 {offsets = [0, 3], sizes = [32, 1], strides = [1, 1]} : vector<32x4xf32> to vector<32x1xf32>
    %c0_4 = arith.constant 0 : index
    %c0_5 = arith.constant 0 : index
    %7 = vector.load %arg4[%c0_4, %c0_5] : memref<32x32xf32, #tpu.memory_space<vmem>>, vector<32x32xf32>
    %cst = arith.constant dense<0.000000e+00> : vector<32x128xf32>
    %8 = tpu.matmul %7, %1, %cst {dimension_numbers = #tpu.dot_dimension_numbers<[1], [0], [0], [1], [0, 0, 1, 1], [], []>} : vector<32x32xf32>, vector<32x128xf32>, vector<32x128xf32> -> vector<32x128xf32>
    %9 = vector.broadcast %3 : vector<32x1xf32> to vector<32x128xf32>
    %10 = arith.mulf %8, %9 : vector<32x128xf32>
    %11 = vector.broadcast %4 : vector<32x1xf32> to vector<32x128xf32>
    %12 = arith.addf %10, %11 : vector<32x128xf32>
    %cst_6 = arith.constant 0.000000e+00 : f32
    %13 = vector.broadcast %cst_6 : f32 to vector<32x128xf32>
    %14 = arith.maximumf %12, %13 : vector<32x128xf32>
    %c0_7 = arith.constant 0 : index
    %c0_8 = arith.constant 0 : index
    %c0_9 = arith.constant 0 : index
    %15 = vector.load %arg5[%c0_7, %c0_8, %c0_9] : memref<3x32x32xf32, #tpu.memory_space<vmem>>, vector<1x32x32xf32>
    %16 = vector.shape_cast %15 : vector<1x32x32xf32> to vector<32x32xf32>
    %cst_10 = arith.constant dense<0.000000e+00> : vector<32x128xf32>
    %17 = tpu.matmul %16, %14, %cst_10 {dimension_numbers = #tpu.dot_dimension_numbers<[1], [0], [0], [1], [0, 0, 1, 1], [], []>} : vector<32x32xf32>, vector<32x128xf32>, vector<32x128xf32> -> vector<32x128xf32>
    %c1 = arith.constant 1 : index
    %c0_11 = arith.constant 0 : index
    %c0_12 = arith.constant 0 : index
    %18 = vector.load %arg5[%c1, %c0_11, %c0_12] : memref<3x32x32xf32, #tpu.memory_space<vmem>>, vector<1x32x32xf32>
    %19 = vector.shape_cast %18 : vector<1x32x32xf32> to vector<32x32xf32>
    %cst_13 = arith.constant dense<0.000000e+00> : vector<32x128xf32>
    %20 = tpu.matmul %19, %14, %cst_13 {dimension_numbers = #tpu.dot_dimension_numbers<[1], [0], [0], [1], [0, 0, 1, 1], [], []>} : vector<32x32xf32>, vector<32x128xf32>, vector<32x128xf32> -> vector<32x128xf32>
    %c2 = arith.constant 2 : index
    %c0_14 = arith.constant 0 : index
    %c0_15 = arith.constant 0 : index
    %21 = vector.load %arg5[%c2, %c0_14, %c0_15] : memref<3x32x32xf32, #tpu.memory_space<vmem>>, vector<1x32x32xf32>
    %22 = vector.shape_cast %21 : vector<1x32x32xf32> to vector<32x32xf32>
    %cst_16 = arith.constant dense<0.000000e+00> : vector<32x128xf32>
    %23 = tpu.matmul %22, %14, %cst_16 {dimension_numbers = #tpu.dot_dimension_numbers<[1], [0], [0], [1], [0, 0, 1, 1], [], []>} : vector<32x32xf32>, vector<32x128xf32>, vector<32x128xf32> -> vector<32x128xf32>
    %24 = tpu.iota {dimensions = array<i32: 1>} : vector<32x128xi32>
    %c0_17 = arith.constant 0 : index
    %c0_18 = arith.constant 0 : index
    %c0_19 = arith.constant 0 : index
    %c0_20 = arith.constant 0 : index
    %25 = vector.load %arg3[%c0_17, %c0_18, %c0_19, %c0_20] : memref<1x1x32x2xf32, #tpu.memory_space<vmem>>, vector<1x1x32x2xf32>
    %26 = vector.shape_cast %25 : vector<1x1x32x2xf32> to vector<32x2xf32>
    %c0_i32 = arith.constant 0 : i32
    %27 = vector.broadcast %c0_i32 : i32 to vector<32x128xi32>
    %28 = arith.cmpi eq, %24, %27 : vector<32x128xi32>
    %29 = vector.extract_strided_slice %26 {offsets = [0, 0], sizes = [32, 1], strides = [1, 1]} : vector<32x2xf32> to vector<32x1xf32>
    %c1_i32 = arith.constant 1 : i32
    %30 = tpu.dynamic_rotate %17 by %c1_i32 dim 1 : vector<32x128xf32>, i32 -> vector<32x128xf32>
    %31 = vector.shape_cast %29 : vector<32x1xf32> to vector<32x1xf32>
    %32 = vector.broadcast %31 : vector<32x1xf32> to vector<32x128xf32>
    %33 = arith.select %28, %32, %30 : vector<32x128xi1>, vector<32x128xf32>
    %c127_i32 = arith.constant 127 : i32
    %34 = vector.broadcast %c127_i32 : i32 to vector<32x128xi32>
    %35 = arith.cmpi eq, %24, %34 : vector<32x128xi32>
    %36 = vector.extract_strided_slice %26 {offsets = [0, 1], sizes = [32, 1], strides = [1, 1]} : vector<32x2xf32> to vector<32x1xf32>
    %c127_i32_21 = arith.constant 127 : i32
    %37 = tpu.dynamic_rotate %23 by %c127_i32_21 dim 1 : vector<32x128xf32>, i32 -> vector<32x128xf32>
    %38 = vector.shape_cast %36 : vector<32x1xf32> to vector<32x1xf32>
    %39 = vector.broadcast %38 : vector<32x1xf32> to vector<32x128xf32>
    %40 = arith.select %35, %39, %37 : vector<32x128xi1>, vector<32x128xf32>
    %41 = arith.addf %20, %33 : vector<32x128xf32>
    %42 = arith.addf %41, %40 : vector<32x128xf32>
    %43 = vector.broadcast %5 : vector<32x1xf32> to vector<32x128xf32>
    %44 = arith.mulf %42, %43 : vector<32x128xf32>
    %45 = vector.broadcast %6 : vector<32x1xf32> to vector<32x128xf32>
    %46 = arith.addf %44, %45 : vector<32x128xf32>
    %47 = arith.addf %46, %1 : vector<32x128xf32>
    %cst_22 = arith.constant 0.000000e+00 : f32
    %48 = vector.broadcast %cst_22 : f32 to vector<32x128xf32>
    %49 = arith.maximumf %47, %48 : vector<32x128xf32>
    %c0_23 = arith.constant 0 : index
    %c0_24 = arith.constant 0 : index
    %c0_25 = arith.constant 0 : index
    %50 = vector.load %arg7[%c0_23, %c0_24, %c0_25] : memref<1x32x128xf32, #tpu.memory_space<vmem>>, vector<1x32x128xf32>
    %51 = vector.shape_cast %50 : vector<1x32x128xf32> to vector<32x128xf32>
    %52 = vector.shape_cast %49 : vector<32x128xf32> to vector<1x32x128xf32>
    tpu.vector_store %arg7[%c0_23, %c0_24, %c0_25], %52 {strides = array<i32>} : memref<1x32x128xf32, #tpu.memory_space<vmem>>, vector<1x32x128xf32>,
    return
  }
  func.func @transform_0(%arg0: i32, %arg1: i32) -> (i32, i32, i32) {
    %c0_i32 = arith.constant 0 : i32
    %c0_i32_0 = arith.constant 0 : i32
    return %arg0, %c0_i32, %arg1 : i32, i32, i32
  }
  func.func @transform_1(%arg0: i32, %arg1: i32) -> (i32, i32, i32, i32) {
    %c0_i32 = arith.constant 0 : i32
    %c0_i32_0 = arith.constant 0 : i32
    %c0_i32_1 = arith.constant 0 : i32
    return %arg0, %arg1, %c0_i32, %c0_i32_0 : i32, i32, i32, i32
  }
  func.func @transform_2(%arg0: i32, %arg1: i32) -> (i32, i32) {
    %c0_i32 = arith.constant 0 : i32
    %c0_i32_0 = arith.constant 0 : i32
    %c0_i32_1 = arith.constant 0 : i32
    return %c0_i32, %c0_i32_0 : i32, i32
  }
  func.func @transform_3(%arg0: i32, %arg1: i32) -> (i32, i32, i32) {
    %c0_i32 = arith.constant 0 : i32
    %c0_i32_0 = arith.constant 0 : i32
    %c0_i32_1 = arith.constant 0 : i32
    %c0_i32_2 = arith.constant 0 : i32
    return %c0_i32, %c0_i32_0, %c0_i32_1 : i32, i32, i32
  }
  func.func @transform_4(%arg0: i32, %arg1: i32) -> (i32, i32) {
    %c0_i32 = arith.constant 0 : i32
    %c0_i32_0 = arith.constant 0 : i32
    %c0_i32_1 = arith.constant 0 : i32
    return %c0_i32, %c0_i32_0 : i32, i32
  }
  func.func @transform_5(%arg0: i32, %arg1: i32) -> (i32, i32, i32) {
    %c0_i32 = arith.constant 0 : i32
    %c0_i32_0 = arith.constant 0 : i32
    return %arg0, %c0_i32, %arg1 : i32, i32, i32
  }
}

</mosaic_0001>

<bundles_post_ra>
// kernel: resnet1d_block.1
= control target key start
LH: loop header
LB: loop body
LE: loop exit
PB: predicated region body
PF: predicated region fallthrough
CT: control target
= control target key end

     0   :  { %s1692_s0 = inlined_call_operand.vmem [shape: f32[2,32,256], index: 0, kind: input, shape index: {}]   ;;  %s1693_s1 = inlined_call_operand.vmem [shape: f32[2,2,32,2], index: 1, kind: input, shape index: {}]   ;;  %s1694_s2 = inlined_call_operand.vmem [shape: f32[32,32], index: 2, kind: input, shape index: {}]   ;;  %s1695_s3 = inlined_call_operand.vmem [shape: f32[3,32,32], index: 3, kind: input, shape index: {}]   ;;  %s1696_s4 = inlined_call_operand.vmem [shape: f32[32,4], index: 4, kind: input, shape index: {}]   ;;  %s1697_s5 = inlined_call_operand.hbm [shape: f32[2,32,256], index: 5, kind: output, shape index: {}]  }
   0x1   :  { %1699 = sst [smem:[#allocation6_spill]] %s1692_s0 }
   0x2   :  { %10 = vsyncpa [#allocation4], 0 }
   0x3   :  { %12 = vsyncpa [#allocation4 + $0x1], 0  ;;  %s1418_s18 = smov 0   ;;  %s1420_s19 = smov 0  }
   0x4   :  { %s1422_s20 = smov 0   ;;  %s1424_s21 = smov 0  }
   0x5   :  { %s1426_s22 = smov 0   ;;  %s1428_s23 = smov 0  }
   0x6   :  { %s1430_s24 = smov 0   ;;  %s1432_s25 = smov 0  }
   0x7 LB: > { %s1027_s26 = sadd.s32 4294967295, %s1376_s25   ;;  %s1028_s27 = sadd.s32 4294967294, %s1376_s25   ;;  %s1376_s25 = sphi %s1432_s25, %s18_s25   ;;  %s1372_s24 = sphi %s1430_s24, %s1711_s24   ;;  %s1368_s23 = sphi %s1428_s23, %s1710_s23   ;;  %s1364_s22 = sphi %s1426_s22, %s1709_s22   ;;  %s1360_s21 = sphi %s1424_s21, %s1708_s21   ;;  %s1356_s20 = sphi %s1422_s20, %s1707_s20   ;;  %s1352_s19 = sphi %s1420_s19, %s1706_s19   ;;  %s1348_s18 = sphi %s1418_s18, %s1705_s18  }
   0x8   : > { %s27_s28 = sadd.s32 1, %s1368_s23  ;;  %s30_s29 = sadd.s32 1, %s1372_s24 }
   0x9   : > { %p28_p0 = scmp.ge.s32.totalorder %s27_s28, 2  ;;  %p46_p1 = scmp.ne.s32.totalorder %s1356_s20, %s1352_s19 }
   0xa   : > { %p47_p2 = scmp.eq.s32.totalorder %s1376_s25, 0  ;;  %p169_p5 = scmp.eq.s32.totalorder %s1027_s26, 3 }
   0xb   : > { %s1713_s28 = smov (%p28_p0, %s27_s28), 0  ;;  %s1715_s29 = smov (!%p28_p0, %s30_s29), %s1372_s24 }
   0xc   : > { %s35_s30 = ssub.s32 %s1368_s23, %s1713_s28  ;;  %p1470_p3 = por %p47_p2, %p46_p1 }
   0xd   : > { %p32_p4 = scmp.ge.s32.totalorder %s1715_s29, 2  ;;  %p174_p6 = scmp.ne.s32.totalorder %s1352_s19, %s1348_s18 }
   0xe   : > { %p175_p7 = scmp.eq.s32.totalorder %s1028_s27, 3  ;;  %p1478_p8 = por %p169_p5, %p46_p1 }
   0xf   : > { %s1717_s29 = smov (%p32_p4, %s1715_s29), 0  ;;  %s39_s11 = sadd.s32 1, %s1356_s20 }
  0x10   : > { %p1482_p9 = por %p175_p7, %p174_p6  ;;  %s34_s9 = ssub.s32 %s1372_s24, %s1717_s29 }
  0x11   : > { %s36_s10 = sor.u32 %s35_s30, %s34_s9  ;;  %p1030_p11 = scmp.ge.s32.totalorder %s1376_s25, 4 }
  0x12   : > { %p37_p10 = scmp.eq.s32.totalorder %s36_s10, 0 }
  0x13   : > { %200 = sbr.rel (%p1030_p11) target bundleno = 38 (0x26), region = 28 }
  0x14   : > { %s1490_s12 = scalar_select %p37_p10, %s1356_s20, %s39_s11  }
  0x1a   : > { %203 = sbr.rel (!%p1470_p3) target bundleno = 38 (0x26), region = 32  ;;  %s205_s13 = sand.u32 (%p1470_p3), 1, %s1356_s20  }
  0x1b   : > { %s1032_s14 = sshll.u32 (%p1470_p3), %s1372_s24, 3  ;;  %s1031_s15 = sshll.u32 (%p1470_p3), %s205_s13, 5 }
  0x1c   : > { %s209_s16 = sadd.s32 (%p1470_p3), %s1368_s23, %s1032_s14  ;;  %s1703_s0 = sld [smem:[#allocation6_spill]] (%p1470_p3) }
  0x1d   : > { %s1033_s17 = sshll.u32 (%p1470_p3), %s209_s16, 3  ;;  %s207_s9 = scalar_lea.vmem (%p1470_p3), [#allocation2], %s1031_s15 }
  0x22   : > { %s211_s30 = scalar_lea.vmem %s1703_s0, %s1033_s17 }
  0x23   : > { %v245_v0 = vld [vmem:[%s211_s30] sm:$0xff]  ;;  %v247_v1 = vld [vmem:[%s211_s30 + $0x10] sm:$0xff] }
  0x24   : > { %v249_v2 = vld [vmem:[%s211_s30 + $0x20] sm:$0xff]  ;;  %246 = vst [vmem:[%s207_s9] sm:$0xff] %v245_v0  ;;  %248 = vst [vmem:[%s207_s9 + $0x8] sm:$0xff] %v247_v1  ;;  %v251_v3 = vld [vmem:[%s211_s30 + $0x30] sm:$0xff] }
  0x25   : > { %250 = vst [vmem:[%s207_s9 + $0x10] sm:$0xff] %v249_v2  ;;  %252 = vst [vmem:[%s207_s9 + $0x18] sm:$0xff] %v251_v3 }
  0x26 PF: > { %p1034_p12 = scmp.ge.s32.totalorder %s1376_s25, 1  ;;  %p269_p13 = scmp.lt.s32.totalorder %s1376_s25, 5 }
  0x28   : > { %p270_p0 = pnand %p1034_p12, %p269_p13 }
  0x29   : > { %s1698_s6 = sand.u32 (!%p270_p0), 1, %s1352_s19   ;;  %v329_v4 = vld [vmem:[%s1694_s2] sm:$0xff] (!%p270_p0)  ;;  %vm333_vm0 = vcmask (!%p270_p0), 261120   ;;  %v1378_v5 = vmov (!%p270_p0), 0   ;;  %v1379_v7 = vmov (!%p270_p0), 1   ;;  %v1521_v8 = vld [vmem:[%s1696_s4 + $0x8] sm:$0xff] (!%p270_p0) }
  0x2a   : > { %273 = sbr.rel (%p270_p0) target bundleno = 654 (0x28e), region = 74  ;;  %s1509_s13 = sshll.u32 (!%p270_p0), %s1698_s6, 5  ;;  %1109 = vmatprep.mubr.msk.f32.mxu0 (!%p270_p0), %vm333_vm0, %v329_v4  ;;  %1269 = vset.pattern.permute.xlu0 (!%p270_p0), %v1378_v5  ;;  %v1515_v6 = vld [vmem:[%s1696_s4] sm:$0xff] (!%p270_p0)  ;;  %v327_v15 = vld [vmem:[%s1696_s4 + $0x10] sm:$0xff] (!%p270_p0)  ;;  %v328_v16 = vld [vmem:[%s1696_s4 + $0x18] sm:$0xff] (!%p270_p0)  ;;  %v1380_v26 = vmov (!%p270_p0), 2  }
  0x2b   : > { %433 = vperm.xlu0 (!%p270_p0), %1269, %v1515_v6   ;;  %1270 = vset.pattern.permute.xlu1 (!%p270_p0), %v1379_v7  ;;  %s278_s26 = scalar_lea.vmem (!%p270_p0), [#allocation2], %s1509_s13  ;;  %v330_v17 = vld [vmem:[%s1694_s2 + $0x8] sm:$0xff] (!%p270_p0)  ;;  %v331_v18 = vld [vmem:[%s1694_s2 + $0x10] sm:$0xff] (!%p270_p0)  ;;  %v332_v19 = vld [vmem:[%s1694_s2 + $0x18] sm:$0xff] (!%p270_p0)  ;;  %p312_p1 = scmp.lt.s32.totalorder (!%p270_p0), %s1364_s22, 1  ;;  %v1381_v27 = vmov (!%p270_p0), 3  }
  0x2c   : > { %v1524_v9 = vld [vmem:[%s278_s26] sm:$0xff] (!%p270_p0)  ;;  %v1526_v10 = vld [vmem:[%s278_s26 + $0x8] sm:$0xff] (!%p270_p0)  ;;  %v1528_v11 = vld [vmem:[%s278_s26 + $0x10] sm:$0xff] (!%p270_p0)  ;;  %456 = vperm.xlu1 (!%p270_p0), %1270, %v1515_v6   ;;  %p314_p2 = scmp.lt.s32.totalorder (!%p270_p0), %s1360_s21, 1  ;;  %s1704_s9 = sand.u32 (!%p270_p0), 1, %s1352_s19  }
  0x2d   : > { %v1157_v12 = vpack.c.bf16 (!%p270_p0), %v1526_v10, %v1524_v9  ;;  %v1533_v13 = vld [vmem:[%s278_s26 + $0x18] sm:$0xff] (!%p270_p0)  ;;  %v479_v20 = vld [vmem:[%s1695_s3] sm:$0xff] (!%p270_p0)  ;;  %v480_v54 = vld [vmem:[%s1695_s3 + $0x8] sm:$0xff] (!%p270_p0)  ;;  %s1640_s10 = scalar_lea.sflag (!%p270_p0), [#allocation4], %s1704_s9 }
  0x2e   : > { %v1161_v14 = vpack.c.bf16 (!%p270_p0), %v1533_v13, %v1528_v11  ;;  %v1052_v21 = vld [vmem:[%s1695_s3 + $0x40] sm:$0xff] (!%p270_p0)  ;;  %1123 = vmatprep.mubr.msk.f32.mxu1 (!%p270_p0), %vm333_vm0, %v479_v20  ;;  %v1053_v55 = vld [vmem:[%s1695_s3 + $0x48] sm:$0xff] (!%p270_p0)  ;;  %v481_v56 = vld [vmem:[%s1695_s3 + $0x10] sm:$0xff] (!%p270_p0) }
  0x2f   : > { %1158 = vmatprep.subr.bf16.mxu0 (!%p270_p0), %v1157_v12  ;;  %438 = vperm.xlu0 (!%p270_p0), %1269, %v1521_v8   ;;  %v1054_v57 = vld [vmem:[%s1695_s3 + $0x50] sm:$0xff] (!%p270_p0)  ;;  %v482_v58 = vld [vmem:[%s1695_s3 + $0x18] sm:$0xff] (!%p270_p0)  ;;  %v1048_v60 = vld [vmem:[%s1695_s3 + $0x20] sm:$0xff] (!%p270_p0) }
  0x30   : > { %1160 = vmatpush3.bf16.msra.mxu0 (!%p270_p0), %v1157_v12  ;;  %460 = vperm.xlu1 (!%p270_p0), %1270, %v1521_v8   ;;  %v1055_v59 = vld [vmem:[%s1695_s3 + $0x58] sm:$0xff] (!%p270_p0)  ;;  %v1049_v61 = vld [vmem:[%s1695_s3 + $0x28] sm:$0xff] (!%p270_p0)  ;;  %v1050_v62 = vld [vmem:[%s1695_s3 + $0x30] sm:$0xff] (!%p270_p0) }
  0x31   : > { %1162 = vmatprep.subr.bf16.mxu0 %v1161_v14  ;;  %s313_s11 = scalar_select %p312_p1, %s1364_s22, 1  ;;  %v1051_v63 = vld [vmem:[%s1695_s3 + $0x38] sm:$0xff] }
  0x32   : > { %s315_s14 = scalar_select %p314_p2, %s1360_s21, 1 }
  0x33   : > { %443 = vperm.xlu0 %1269, %v327_v15   ;;  %s1038_s15 = sshll.u32 %s313_s11, 3 }
  0x34   : > { %1164 = vmatpush3.bf16.msra.mxu0 %v1161_v14  ;;  %1271 = vset.pattern.permute.xlu1 %v1378_v5  ;;  %s1037_s16 = sshll.u32 %s315_s14, 2  ;;  %s1384_s14 = smov [#allocation3]  }
  0x35   : > { %448 = vperm.xlu1 %1271, %v328_v16   ;;  %s318_s17 = sadd.s32 %s1038_s15, %s1037_s16  ;;  %s1382_s16 = smov 127  }
  0x36   : > { %s1039_s26 = sshll.u32 %s318_s17, 3  ;;  %s1383_s17 = smov 1  }
  0x37   : > { %1110 = vmatmul.mubr.msk.f32.vlgmr.msra.gmra.mrb[0].mxu0 %vm333_vm0, %v330_v17  ;;  %1272 = vset.pattern.permute.xlu0 %v1379_v7  ;;  %s320_s27 = scalar_lea.vmem %s1693_s1, %s1039_s26  ;;  %s311_s26 = scalar_lea.vmem [#allocation3], %s1509_s13 }
  0x38   : > { %1112 = vmatprep.mubr.msk.f32.mxu0 %vm333_vm0, %v331_v18  ;;  %464 = vperm.xlu0 %1272, %v327_v15   ;;  %v690_v22 = vld [vmem:[%s320_s27 + $0x8] sm:$0xff]  ;;  %v689_v23 = vld [vmem:[%s320_s27] sm:$0xff]  ;;  %v691_v24 = vld [vmem:[%s320_s27 + $0x10] sm:$0xff]  ;;  %s923_s13 = sshll.u32 %s311_s26, 4  ;;  %s1286_s15 = sshll.u32 %s1384_s14, 4  ;;  %s1630_s13 = int_to_ptr.vmem [resolvable:$true] %s923_s13  ;;  %s1287_s15 = int_to_ptr.vmem [resolvable:$false] %s1286_s15 }
  0x39   : > { %1273 = vset.pattern.permute.xlu1 %v1379_v7  ;;  %v692_v25 = vld [vmem:[%s320_s27 + $0x18] sm:$0xff]  ;;  %s1065_s27 = sshll.u32 %s1364_s22, 3  ;;  %s1282_s11 = scalar_lea.vmem %s1630_s13, 512 }
  0x3a   : > { %468 = vperm.xlu1 %1273, %v328_v16   ;;  %s920_s0 = sadd.s32 %s1360_s21, %s1065_s27  ;;  %p1283_p3 = scmp.ne.s32.totalorder %s1630_s13, %s1282_s11 }
  0x3b   : > { %1113 = vmatmul.mubr.msk.f32.gmra.mrb[2].mxu0 %vm333_vm0, %v332_v19  ;;  %s1066_s6 = sshll.u32 %s920_s0, 7  ;;  %p1289_p6 = scmp.lt.s32.totalorder %s1630_s13, %s1287_s15 }
  0x3c   : > { %1274 = vset.pattern.permute.xlu0 %v1378_v5  ;;  %1137 = vmatprep.mubr.msk.f32.mxu0 %vm333_vm0, %v1052_v21  ;;  %s1636_s21 = scalar_lea.hbm %s1697_s5, %s1066_s6  ;;  %p1284_p4 = pnand %p1283_p3, %p1478_p8 }
  0x3d   : > { %704 = vperm.xlu0 %1274, %v689_v23  }
  0x3e   : > { %1275 = vset.pattern.permute.xlu1 %v1378_v5  ;;  %p1285_p5 = pneg %p1284_p4 }
  0x3f   : > { %709 = vperm.xlu1 %1275, %v690_v22  }
  0x41   : > { %719 = vperm.xlu0 %1274, %v692_v25  }
  0x43   : > { %714 = vperm.xlu1 %1275, %v691_v24  }
  0x45   : > { %1277 = vset.pattern.permute.xlu0 %v1379_v7 }
  0x46   : > { %740 = vperm.xlu0 %1277, %v690_v22  }
  0x47   : > { %1276 = vset.pattern.permute.xlu1 %v1379_v7 }
  0x48   : > { %736 = vperm.xlu1 %1276, %v689_v23  }
  0x4a   : > { %1278 = vset.pattern.permute.xlu0 %v1380_v26 }
  0x4b   : > { %857 = vperm.xlu0 %1278, %v1515_v6  }
  0x4c   : > { %744 = vperm.xlu1 %1276, %v691_v24  }
  0x4f   : > { %869 = vperm.xlu0 %1278, %v328_v16  }
  0x50   : > { %748 = vperm.xlu1 %1276, %v692_v25  }
  0x53   : > { %1280 = vset.pattern.permute.xlu0 %v1381_v27 }
  0x54   : > { %1279 = vset.pattern.permute.xlu1 %v1380_v26  ;;  %877 = vperm.xlu0 %1280, %v1515_v6  }
  0x55   : > { %861 = vperm.xlu1 %1279, %v1521_v8  }
  0x58   : > { %889 = vperm.xlu0 %1280, %v328_v16  }
  0x59   : > { %865 = vperm.xlu1 %1279, %v327_v15  }
  0x5d   : > { %1281 = vset.pattern.permute.xlu1 %v1381_v27 }
  0x5e   : > { %881 = vperm.xlu1 %1281, %v1521_v8  }
  0x62   : > { %885 = vperm.xlu1 %1281, %v327_v15  }
  0xaa   : > { %v434_v29 = vpop.permute.xlu0 %433 }
  0xab   : > { %v457_v28 = vpop.permute.xlu1 %456 }
  0xae   : > { %v439_v31 = vpop.permute.xlu0 %438 }
  0xaf   : > { %v461_v30 = vpop.permute.xlu1 %460 }
  0xb2   : > { %v444_v34 = vpop.permute.xlu0 %443 }
  0xb4   : > { %v449_v32 = vpop.permute.xlu1 %448 }
  0xb7   : > { %v465_v45 = vpop.permute.xlu0 %464 }
  0xb9   : > { %v469_v41 = vpop.permute.xlu1 %468 }
  0xbc   : > { %v705_v18 = vpop.permute.xlu0 %704 }
  0xbe   : > { %v710_v16 = vpop.permute.xlu1 %709 }
  0xc0   : > { %v720_v20 = vpop.permute.xlu0 %719 }
  0xc2   : > { %v715_v17 = vpop.permute.xlu1 %714 }
  0xc5   : > { %v741_v22 = vpop.permute.xlu0 %740 }
  0xc7   : > { %v737_v19 = vpop.permute.xlu1 %736 }
  0xca   : > { %v858_v24 = vpop.permute.xlu0 %857 }
  0xcb   : > { %v745_v21 = vpop.permute.xlu1 %744 }
  0xce   : > { %v870_v26 = vpop.permute.xlu0 %869 }
  0xcf   : > { %v749_v23 = vpop.permute.xlu1 %748 }
  0xd4   : > { %v862_v25 = vpop.permute.xlu1 %861 }
  0xd8   : > { %v866_v27 = vpop.permute.xlu1 %865 }
 0x10a   : > { %v1111_v33 = vpop.f32.mrb[0].mxu0 }
 0x10b   : > { %v452_v35 = vmul.f32 %v1111_v33, %v439_v31  ;;  %v412_v36 = vpop.f32.mrb[1].mxu0 }
 0x10c   : > { %v451_v37 = vmul.f32 %v434_v29, %v412_v36  ;;  %v882_v29 = vpop.permute.xlu1 %881 }
 0x10d   : > { %v472_v38 = vadd.f32 %v461_v30, %v452_v35  ;;  %v687_v30 = vlaneseq }
 0x10e   : > { %v471_v39 = vadd.f32 %v457_v28, %v451_v37  ;;  %v1114_v40 = vpop.f32.mrb[2].mxu0  ;;  %v878_v28 = vpop.permute.xlu0 %877 }
 0x10f   : > { %v476_v42 = vmax.f32 %v472_v38, 0.0  ;;  %v454_v43 = vmul.f32 %v1114_v40, %v449_v32  ;;  %v422_v44 = vpop.f32.mrb[3].mxu0  ;;  %v688_v32 = vand.u32 127, %v687_v30 }
 0x110   : > { %v475_v46 = vmax.f32 %v471_v39, 0.0  ;;  %v453_v47 = vmul.f32 %v444_v34, %v422_v44  ;;  %v886_v33 = vpop.permute.xlu1 %885 }
 0x111   : > { %v474_v48 = vadd.f32 %v469_v41, %v454_v43  ;;  %vm693_vm1 = vcmp.eq.s32.totalorder %v688_v32, 0  ;;  %vm726_vm2 = vcmp.eq.s32.totalorder %v688_v32, 127 }
 0x112   : > { %v1165_v49 = vpack.c.bf16 %v476_v42, %v475_v46  ;;  %v473_v50 = vadd.f32 %v465_v45, %v453_v47  ;;  %v890_v31 = vpop.permute.xlu0 %889 }
 0x113   : > { %v478_v51 = vmax.f32 %v474_v48, 0.0 }
 0x114   : > { %v477_v52 = vmax.f32 %v473_v50, 0.0  ;;  %1166 = vmatprep.subr.bf16.mxu1 %v1165_v49  ;;  %1174 = vmatprep.subr.bf16.mxu0 %v1165_v49 }
 0x115   : > { %1168 = vmatpush3.bf16.msra.mxu1 %v1165_v49  ;;  %1176 = vmatpush3.bf16.msra.mxu0 %v1165_v49 }
 0x116   : > { %v1169_v53 = vpack.c.bf16 %v478_v51, %v477_v52 }
 0x118   : > { %1170 = vmatprep.subr.bf16.mxu1 %v1169_v53  ;;  %1178 = vmatprep.subr.bf16.mxu0 %v1169_v53 }
 0x119   : > { %1172 = vmatpush3.bf16.msra.mxu1 %v1169_v53  ;;  %1180 = vmatpush3.bf16.msra.mxu0 %v1169_v53 }
 0x11a   : > { %1182 = vmatprep.subr.bf16.mxu1 %v1165_v49 }
 0x11c   : > { %1124 = vmatmul.mubr.msk.f32.vlgmr.msra.gmra.mrb[0].mxu1 %vm333_vm0, %v480_v54  ;;  %1138 = vmatmul.mubr.msk.f32.vlgmr.msra.gmra.mrb[4].mxu0 %vm333_vm0, %v1053_v55 }
 0x11d   : > { %1184 = vmatpush3.bf16.msra.mxu1 %v1165_v49  ;;  %1126 = vmatprep.mubr.msk.f32.mxu1 %vm333_vm0, %v481_v56 }
 0x11e   : > { %1186 = vmatprep.subr.bf16.mxu1 %v1169_v53  ;;  %1140 = vmatprep.mubr.msk.f32.mxu0 %vm333_vm0, %v1054_v57 }
 0x120   : > { %1127 = vmatmul.mubr.msk.f32.gmra.mrb[2].mxu1 %vm333_vm0, %v482_v58  ;;  %1141 = vmatmul.mubr.msk.f32.gmra.mrb[6].mxu0 %vm333_vm0, %v1055_v59 }
 0x121   : > { %1188 = vmatpush3.bf16.msra.mxu1 %v1169_v53  ;;  %1151 = vmatprep.mubr.msk.f32.mxu1 %vm333_vm0, %v1048_v60 }
 0x124   : > { %1152 = vmatmul.mubr.msk.f32.vlgmr.msra.gmra.mrb[4].mxu1 %vm333_vm0, %v1049_v61 }
 0x125   : > { %1154 = vmatprep.mubr.msk.f32.mxu1 %vm333_vm0, %v1050_v62 }
 0x128   : > { %1155 = vmatmul.mubr.msk.f32.gmra.mrb[6].mxu1 %vm333_vm0, %v1051_v63 }
 0x1ef   : > { %v1125_v0 = vpop.f32.mrb[0].mxu1  ;;  %v1139_v1 = vpop.f32.mrb[4].mxu0 }
 0x1f0   : > { %729 = vrot.lane.b32.xlu0 %v1139_v1, %s1382_s16  ;;  %696 = vrot.lane.b32.xlu1 %v1125_v0, %s1383_s17  ;;  %v561_v2 = vpop.f32.mrb[1].mxu1  ;;  %v668_v3 = vpop.f32.mrb[5].mxu0 }
 0x1f3   : > { %v1128_v4 = vpop.f32.mrb[2].mxu1  ;;  %v1142_v5 = vpop.f32.mrb[6].mxu0 }
 0x1f4   : > { %694 = vrot.lane.b32.xlu1 %v561_v2, %s1383_s17  ;;  %v571_v6 = vpop.f32.mrb[3].mxu1  ;;  %v678_v7 = vpop.f32.mrb[7].mxu0 }
 0x1f5   : > { %698 = vrot.lane.b32.xlu0 %v571_v6, %s1383_s17 }
 0x1f7   : > { %v1153_v8 = vpop.f32.mrb[4].mxu1 }
 0x1f8   : > { %727 = vrot.lane.b32.xlu1 %v668_v3, %s1382_s16  ;;  %v833_v12 = vpop.f32.mrb[5].mxu1 }
 0x1f9   : > { %733 = vrot.lane.b32.xlu0 %v1142_v5, %s1382_s16 }
 0x1fb   : > { %v1156_v14 = vpop.f32.mrb[6].mxu1 }
 0x1fc   : > { %700 = vrot.lane.b32.xlu1 %v1128_v4, %s1383_s17  ;;  %v843_v15 = vpop.f32.mrb[7].mxu1 }
 0x200   : > { %731 = vrot.lane.b32.xlu1 %v678_v7, %s1382_s16  ;;  %s1288_s16 = scalar_lea.vmem %s1287_s15, 1024 }
 0x201   : > { %p1290_p7 = scmp.lt.s32.totalorder %s1288_s16, %s1282_s11 }
 0x203   : > { %p1291_p10 = por %p1290_p7, %p1289_p6 }
 0x205   : > { %p1292_p11 = pnand %p1291_p10, %p1285_p5 }
 0x262   : > { %v730_v34 = vpop.permute.xlu0 %729  ;;  %v697_v35 = vpop.permute.xlu1 %696 }
 0x263   : > { %v723_v36 = vsel %vm693_vm1, %v710_v16, %v697_v35  ;;  %v752_v38 = vsel %vm726_vm2, %v741_v22, %v730_v34 }
 0x264   : > { %v839_v37 = vadd.f32 %v1153_v8, %v723_v36 }
 0x266   : > { %v853_v39 = vadd.f32 %v839_v37, %v752_v38  ;;  %v695_v40 = vpop.permute.xlu1 %694 }
 0x267   : > { %v722_v41 = vsel %vm693_vm1, %v705_v18, %v695_v40  ;;  %v699_v43 = vpop.permute.xlu0 %698 }
 0x268   : > { %v873_v42 = vmul.f32 %v862_v25, %v853_v39  ;;  %v834_v45 = vadd.f32 %v833_v12, %v722_v41  ;;  %v724_v54 = vsel %vm693_vm1, %v715_v17, %v699_v43 }
 0x269   : > { %v844_v59 = vadd.f32 %v843_v15, %v724_v54 }
 0x26a   : > { %v893_v44 = vadd.f32 %v882_v29, %v873_v42  ;;  %v728_v46 = vpop.permute.xlu1 %727 }
 0x26b   : > { %v751_v47 = vsel %vm726_vm2, %v737_v19, %v728_v46  ;;  %v734_v52 = vpop.permute.xlu0 %733 }
 0x26c   : > { %v897_v48 = vadd.f32 %v893_v44, %v1526_v10  ;;  %v852_v49 = vadd.f32 %v834_v45, %v751_v47  ;;  %v754_v58 = vsel %vm726_vm2, %v749_v23, %v734_v52 }
 0x26e   : > { %v901_v50 = vmax.f32 %v897_v48, 0.0  ;;  %v872_v51 = vmul.f32 %v858_v24, %v852_v49  ;;  %v701_v53 = vpop.permute.xlu1 %700 }
 0x26f   : > { %v725_v55 = vsel %vm693_vm1, %v720_v20, %v701_v53 }
 0x270   : > { %905 = vst [vmem:[%s311_s26 + $0x8] sm:$0xff] %v901_v50  ;;  %v892_v56 = vadd.f32 %v878_v28, %v872_v51  ;;  %v849_v57 = vadd.f32 %v1156_v14, %v725_v55 }
 0x272   : > { %v896_v10 = vadd.f32 %v892_v56, %v1524_v9  ;;  %v855_v60 = vadd.f32 %v849_v57, %v754_v58  ;;  %v732_v61 = vpop.permute.xlu1 %731 }
 0x273   : > { %v753_v62 = vsel %vm726_vm2, %v745_v21, %v732_v61 }
 0x274   : > { %v900_v63 = vmax.f32 %v896_v10, 0.0  ;;  %v875_v0 = vmul.f32 %v870_v26, %v855_v60  ;;  %v854_v1 = vadd.f32 %v844_v59, %v753_v62 }
 0x276   : > { %904 = vst [vmem:[%s311_s26] sm:$0xff] %v900_v63  ;;  %v895_v2 = vadd.f32 %v890_v31, %v875_v0  ;;  %v874_v3 = vmul.f32 %v866_v27, %v854_v1 }
 0x278   : > { %v899_v4 = vadd.f32 %v895_v2, %v1533_v13  ;;  %v894_v5 = vadd.f32 %v886_v33, %v874_v3 }
 0x27a   : > { %v903_v9 = vmax.f32 %v899_v4, 0.0  ;;  %v898_v6 = vadd.f32 %v894_v5, %v1528_v11 }
 0x27c   : > { %907 = vst [vmem:[%s311_s26 + $0x18] sm:$0xff] %v903_v9  ;;  %v902_v7 = vmax.f32 %v898_v6, 0.0 }
 0x27e   : > { %906 = vst [vmem:[%s311_s26 + $0x10] sm:$0xff] %v902_v7 }
 0x27f   : > { %1295 = shalt.err (!%p1292_p11)
}
 0x280   : > { %s1296_s17 = scalar_lea.hbm %s1636_s21, 512  ;;  %s1300_s0 = scalar_lea.hbm %s1697_s5, 2048 }
 0x281   : > { %p1297_p12 = scmp.ne.s32.totalorder %s1636_s21, %s1296_s17  ;;  %p1301_p1 = scmp.lt.u32.totalorder %s1636_s21, %s1697_s5 }
 0x282   : > { %p1302_p2 = scmp.lt.u32.totalorder %s1300_s0, %s1296_s17  ;;  %p1304_p4 = scmp.lt.u32.totalorder %s1296_s17, %s1636_s21 }
 0x283   : > { %p1298_p13 = pnand %p1297_p12, %p1478_p8 }
 0x284   : > { %p1303_p3 = por %p1302_p2, %p1301_p1 }
 0x285   : > { %p1299_p0 = pneg %p1298_p13 }
 0x286   : > { %p1305_p5 = por %p1304_p4, %p1303_p3 }
 0x288   : > { %p1306_p6 = pnand %p1305_p5, %p1299_p0 }
 0x28a   : > { %1309 = shalt.err (!%p1306_p6)
}
 0x28b   : > { %s1385_s30 = smov 128   ;;  %s1386_s9 = smov 256  }
 0x28c   : > { %s1387_s11 = smov 8  }
 0x28d   : > { %1189 = dma.vmem_to_hbm [thread:$0]  (%p1478_p8), %s1630_s13, 512, %s1636_s21, %s1640_s10, %s1385_s30, %s1386_s9, %s1387_s11  }
 0x28e PF: > { %p1195_p7 = scmp.ge.s32.totalorder %s1376_s25, 2  ;;  %s938_s14 = sand.u32 1, %s1348_s18  }
 0x28f   : > { %s939_s15 = scalar_lea.sflag [#allocation4], %s938_s14 }
 0x290   : > { %p1192_p10 = pnand %p1195_p7, %p1482_p9 }
 0x292   : > { %1343 = dma.done.wait (!%p1192_p10), %s939_s15, 512  }
 0x293   : > { %1345 = vsyncadd (!%p1192_p10), %s939_s15, 4294966784  ;;  %s18_s25 = sadd.s32 1, %s1376_s25   ;;  %s1705_s18 = smov %s1352_s19 }
 0x294   : > { %p15_p11 = scmp.ge.s32.totalorder %s18_s25, 6   ;;  %s1706_s19 = smov %s1356_s20 }
 0x295   : > { %s1707_s20 = smov %s1490_s12  ;;  %s1708_s21 = smov %s1368_s23 }
 0x296   : > { %s1709_s22 = smov %s1372_s24  ;;  %s1710_s23 = smov %s1713_s28 }
 0x297   : > { %s1711_s24 = smov %s1717_s29  ;;  %17 = sbr.rel (!%p15_p11) target bundleno = 7 (0x7), region = 123 }
 0x29e   :  { %944 = vsyncpa [#allocation4], 1 }
 0x29f   :  { %946 = vsyncpa [#allocation4 + $0x1], 1 }

</bundles_post_ra>
